<compile_context>
chip_gen: v7x
topology: tpu7x:2x2x1
jax: 0.10.0
libtpu: 0.0.40
codegen_flags: <defaults>
</compile_context>

<pallas_src>
import functools
import math

import jax
import jax.numpy as jnp
import numpy as np
from jax.experimental import pallas as pl
from jax.experimental.pallas import tpu as pltpu


# ----------------------------- Pallas kernel --------------------------------
def _auvi_subnet_kernel(T, H,
                        x_ref,     # (T*B, IN)  f32, time-major flattened sequence
                        len_ref,   # (B, 1)     i32, valid lengths
                        wih_ref,   # (IN, 4H)   f32, packed LSTM input weights (i,f,o,g)
                        whh_ref,   # (H, 4H)    f32, packed LSTM recurrent weights
                        b_ref,     # (1, 4H)    f32, packed LSTM bias (b_ih + b_hh)
                        w1_ref,    # (H, OUT)   f32, linear_1 weight
                        b1_ref,    # (1, OUT)   f32, linear_1 bias
                        o_ref):    # (B, OUT)   f32, output
    B = len_ref.shape[0]

    lens = len_ref[...]                        # (B, 1) int32
    whh = whh_ref[...]                         # (H, 4H) hoisted out of the loop

    # Hoisted input projection for ALL timesteps: one GEMM, bias folded in.
    #   (T*B, IN) x (IN, 4H) -> (T*B, 4H)
    xw = jnp.dot(x_ref[...], wih_ref[...],
                 preferred_element_type=jnp.float32) + b_ref[...]

    h = jnp.zeros((B, H), jnp.float32)
    c = jnp.zeros((B, H), jnp.float32)

    # Fully unrolled recurrence (T is small & static). Only h @ Whh is serial.
    # TODO(synk): for long variable-length audio, bound the loop by max(lengths)
    # via scalar prefetch and time-chunk x with a BlockSpec grid axis.
    for t in range(T):
        gates = xw[t * B:(t + 1) * B] + jnp.dot(
            h, whh, preferred_element_type=jnp.float32)          # (B, 4H)

        # Gate order (i, f, o, g): one sigmoid over the contiguous 3H slab,
        # one tanh over the tail slab.
        sig = jax.nn.sigmoid(gates[:, 0:3 * H])
        i_g = sig[:, 0 * H:1 * H]
        f_g = sig[:, 1 * H:2 * H]
        o_g = sig[:, 2 * H:3 * H]
        g_g = jnp.tanh(gates[:, 3 * H:4 * H])

        c_new = f_g * c + i_g * g_g
        h_new = o_g * jnp.tanh(c_new)

        # pack_padded_sequence semantics: freeze state once t >= lengths[b],
        # so the final (h, c) are the values at each sequence's last valid step.
        mask = lens > t                                           # (B, 1) bool
        h = jnp.where(mask, h_new, h)
        c = jnp.where(mask, c_new, c)

    # dropout is identity in eval mode; then linear_1.
    y = jnp.dot(h, w1_ref[...], preferred_element_type=jnp.float32) + b1_ref[...]
    o_ref[...] = y.astype(o_ref.dtype)


# ------------------------------ wrapper --------------------------------------
@jax.jit
def auvi_subnet_forward(x, lengths, packed):
    """x: (B, T, IN) f32, lengths: (B,) int -> (B, OUT) f32."""
    B, T, IN = x.shape
    H = packed["whh"].shape[0]
    OUT = packed["w1"].shape[1]

    # Time-major flat layout: row t*B + b. Pure layout plumbing in the wrapper.
    x_flat = jnp.transpose(x, (1, 0, 2)).reshape(T * B, IN)
    lens = lengths.astype(jnp.int32).reshape(B, 1)

    kernel = functools.partial(_auvi_subnet_kernel, T, H)
    vmem = pl.BlockSpec(memory_space=pltpu.MemorySpace.VMEM)  # whole arrays in VMEM

    return pl.pallas_call(
        kernel,
        out_shape=jax.ShapeDtypeStruct((B, OUT), jnp.float32),
        in_specs=[vmem] * 7,
        out_specs=vmem,
    )(x_flat, lens, packed["wih"], packed["whh"], packed["b"],
      packed["w1"], packed["b1"])


# ---------------------- PyTorch-layout params + repack ------------------------
def init_torch_params(key, in_size, hidden, out_size):
    """Synthetic weights in PyTorch's native layout / gate order (i, f, g, o),
    with the default nn.LSTM / nn.Linear uniform(-1/sqrt(H), 1/sqrt(H)) bounds."""
    ks = jax.random.split(key, 6)
    k = 1.0 / math.sqrt(hidden)
    u = lambda kk, shape: jax.random.uniform(kk, shape, jnp.float32, -k, k)
    return {
        "w_ih": u(ks[0], (4 * hidden, in_size)),   # rnn.weight_ih_l0
        "w_hh": u(ks[1], (4 * hidden, hidden)),    # rnn.weight_hh_l0
        "b_ih": u(ks[2], (4 * hidden,)),           # rnn.bias_ih_l0
        "b_hh": u(ks[3], (4 * hidden,)),           # rnn.bias_hh_l0
        "w1":   u(ks[4], (out_size, hidden)),      # linear_1.weight
        "b1":   u(ks[5], (out_size,)),             # linear_1.bias
    }


def pack_params(tp, hidden):
    """Repack PyTorch-layout weights into the kernel's right-multiply layout with
    gate order (i, f, o, g) so the three sigmoid gates are lane-contiguous."""
    H = hidden
    perm = np.concatenate([np.arange(0, H),            # i
                           np.arange(H, 2 * H),        # f
                           np.arange(3 * H, 4 * H),    # o
                           np.arange(2 * H, 3 * H)])   # g
    wih = jnp.transpose(tp["w_ih"], (1, 0))[:, perm]          # (IN, 4H)
    whh = jnp.transpose(tp["w_hh"], (1, 0))[:, perm]          # (H, 4H)
    b = (tp["b_ih"] + tp["b_hh"])[perm].reshape(1, 4 * H)     # (1, 4H)
    w1 = jnp.transpose(tp["w1"], (1, 0))                      # (H, OUT)
    b1 = tp["b1"].reshape(1, -1)                              # (1, OUT)
    return {"wih": wih, "whh": whh, "b": b, "w1": w1, "b1": b1}


# --------------------------- reference (pure JAX) -----------------------------
def auvi_subnet_reference(x, lengths, tp):
    """Mirrors nn.LSTM (PyTorch gate order i,f,g,o) + packed-sequence final state
    + eval-mode dropout + linear_1, directly from the PyTorch-layout params."""
    B, T, _ = x.shape
    H = tp["w_hh"].shape[1]
    wih = tp["w_ih"].T                     # (IN, 4H)
    whh = tp["w_hh"].T                     # (H, 4H)
    b = (tp["b_ih"] + tp["b_hh"])[None, :]
    h = jnp.zeros((B, H), jnp.float32)
    c = jnp.zeros((B, H), jnp.float32)
    lens = lengths.astype(jnp.int32)
    for t in range(T):
        gates = x[:, t, :] @ wih + h @ whh + b
        i_g = jax.nn.sigmoid(gates[:, 0 * H:1 * H])
        f_g = jax.nn.sigmoid(gates[:, 1 * H:2 * H])
        g_g = jnp.tanh(gates[:, 2 * H:3 * H])
        o_g = jax.nn.sigmoid(gates[:, 3 * H:4 * H])
        c_new = f_g * c + i_g * g_g
        h_new = o_g * jnp.tanh(c_new)
        mask = (lens > t)[:, None]
        h = jnp.where(mask, h_new, h)
        c = jnp.where(mask, c_new, c)
    return h @ tp["w1"].T + tp["b1"][None, :]


# --------------------------------- main ---------------------------------------
if __name__ == "__main__":
    # Shapes implied by the module: x (batch, seq_len, in_size), lengths (batch,)
    B, T = 2, 8
    IN_SIZE, HIDDEN, OUT_SIZE = 16, 32, 16

    key = jax.random.PRNGKey(0)
    k_x, k_p = jax.random.split(key)
    x = jax.random.normal(k_x, (B, T, IN_SIZE), jnp.float32)
    lengths = jnp.array([T, 5], dtype=jnp.int32)     # variable-length sequences

    tp = init_torch_params(k_p, IN_SIZE, HIDDEN, OUT_SIZE)
    packed = pack_params(tp, HIDDEN)

    out = jax.block_until_ready(auvi_subnet_forward(x, lengths, packed))
    ref = auvi_subnet_reference(x, lengths, tp)
    np.testing.assert_allclose(np.asarray(out), np.asarray(ref), rtol=1e-3, atol=1e-3)

    print("KERNEL_OK")
</pallas_src>

<mosaic_0001>
module attributes {stable_mosaic.version = 11 : i64} {
  func.func @_auvi_subnet_kernel(%arg0: memref<16x16xf32, #tpu.memory_space<vmem>>, %arg1: memref<2x1xi32, #tpu.memory_space<vmem>>, %arg2: memref<16x128xf32, #tpu.memory_space<vmem>>, %arg3: memref<32x128xf32, #tpu.memory_space<vmem>>, %arg4: memref<1x128xf32, #tpu.memory_space<vmem>>, %arg5: memref<32x16xf32, #tpu.memory_space<vmem>>, %arg6: memref<1x16xf32, #tpu.memory_space<vmem>>, %arg7: memref<2x16xf32, #tpu.memory_space<vmem>>) attributes {dimension_semantics = [], scalar_prefetch = 0 : i64, scratch_operands = 0 : i64, tpu.core_type = #tpu.core_type<tc>} {
    %c0 = arith.constant 0 : index
    %c0_0 = arith.constant 0 : index
    %0 = vector.load %arg1[%c0, %c0_0] : memref<2x1xi32, #tpu.memory_space<vmem>>, vector<2x1xi32>
    %c0_1 = arith.constant 0 : index
    %c0_2 = arith.constant 0 : index
    %1 = vector.load %arg3[%c0_1, %c0_2] : memref<32x128xf32, #tpu.memory_space<vmem>>, vector<32x128xf32>
    %c0_3 = arith.constant 0 : index
    %c0_4 = arith.constant 0 : index
    %2 = vector.load %arg0[%c0_3, %c0_4] : memref<16x16xf32, #tpu.memory_space<vmem>>, vector<16x16xf32>
    %c0_5 = arith.constant 0 : index
    %c0_6 = arith.constant 0 : index
    %3 = vector.load %arg2[%c0_5, %c0_6] : memref<16x128xf32, #tpu.memory_space<vmem>>, vector<16x128xf32>
    %cst = arith.constant dense<0.000000e+00> : vector<16x128xf32>
    %4 = tpu.matmul %2, %3, %cst {dimension_numbers = #tpu.dot_dimension_numbers<[1], [0], [0], [1], [0, 0, 1, 1], [], []>} : vector<16x16xf32>, vector<16x128xf32>, vector<16x128xf32> -> vector<16x128xf32>
    %c0_7 = arith.constant 0 : index
    %c0_8 = arith.constant 0 : index
    %5 = vector.load %arg4[%c0_7, %c0_8] : memref<1x128xf32, #tpu.memory_space<vmem>>, vector<1x128xf32>
    %6 = vector.broadcast %5 : vector<1x128xf32> to vector<16x128xf32>
    %7 = arith.addf %4, %6 : vector<16x128xf32>
    %cst_9 = arith.constant 0.000000e+00 : f32
    %8 = vector.broadcast %cst_9 : f32 to vector<2x32xf32>
    %cst_10 = arith.constant 0.000000e+00 : f32
    %9 = vector.broadcast %cst_10 : f32 to vector<2x32xf32>
    %10 = vector.extract_strided_slice %7 {offsets = [0, 0], sizes = [2, 128], strides = [1, 1]} : vector<16x128xf32> to vector<2x128xf32>
    %cst_11 = arith.constant dense<0.000000e+00> : vector<2x128xf32>
    %11 = tpu.matmul %8, %1, %cst_11 {dimension_numbers = #tpu.dot_dimension_numbers<[1], [0], [0], [1], [0, 0, 1, 1], [], []>} : vector<2x32xf32>, vector<32x128xf32>, vector<2x128xf32> -> vector<2x128xf32>
    %12 = arith.addf %10, %11 : vector<2x128xf32>
    %13 = vector.extract_strided_slice %12 {offsets = [0, 0], sizes = [2, 96], strides = [1, 1]} : vector<2x128xf32> to vector<2x96xf32>
    %14 = arith.negf %13 : vector<2x96xf32>
    %15 = math.exp %14 : vector<2x96xf32>
    %cst_12 = arith.constant 1.000000e+00 : f32
    %16 = vector.broadcast %cst_12 : f32 to vector<2x96xf32>
    %17 = arith.addf %16, %15 : vector<2x96xf32>
    %18 = arith.divf %16, %17 : vector<2x96xf32>
    %19 = vector.extract_strided_slice %18 {offsets = [0, 0], sizes = [2, 32], strides = [1, 1]} : vector<2x96xf32> to vector<2x32xf32>
    %20 = vector.extract_strided_slice %18 {offsets = [0, 32], sizes = [2, 32], strides = [1, 1]} : vector<2x96xf32> to vector<2x32xf32>
    %21 = vector.extract_strided_slice %18 {offsets = [0, 64], sizes = [2, 32], strides = [1, 1]} : vector<2x96xf32> to vector<2x32xf32>
    %22 = vector.extract_strided_slice %12 {offsets = [0, 96], sizes = [2, 32], strides = [1, 1]} : vector<2x128xf32> to vector<2x32xf32>
    %23 = math.tanh %22 : vector<2x32xf32>
    %24 = arith.mulf %20, %9 : vector<2x32xf32>
    %25 = arith.mulf %19, %23 : vector<2x32xf32>
    %26 = arith.addf %24, %25 : vector<2x32xf32>
    %27 = math.tanh %26 : vector<2x32xf32>
    %28 = arith.mulf %21, %27 : vector<2x32xf32>
    %c0_i32 = arith.constant 0 : i32
    %29 = vector.broadcast %c0_i32 : i32 to vector<2x1xi32>
    %30 = arith.cmpi sgt, %0, %29 : vector<2x1xi32>
    %31 = vector.shape_cast %30 : vector<2x1xi1> to vector<2x1xi1>
    %32 = vector.broadcast %31 : vector<2x1xi1> to vector<2x32xi1>
    %33 = arith.select %32, %28, %8 : vector<2x32xi1>, vector<2x32xf32>
    %34 = vector.shape_cast %30 : vector<2x1xi1> to vector<2x1xi1>
    %35 = vector.broadcast %34 : vector<2x1xi1> to vector<2x32xi1>
    %36 = arith.select %35, %26, %9 : vector<2x32xi1>, vector<2x32xf32>
    %37 = vector.extract_strided_slice %7 {offsets = [2, 0], sizes = [2, 128], strides = [1, 1]} : vector<16x128xf32> to vector<2x128xf32>
    %cst_13 = arith.constant dense<0.000000e+00> : vector<2x128xf32>
    %38 = tpu.matmul %33, %1, %cst_13 {dimension_numbers = #tpu.dot_dimension_numbers<[1], [0], [0], [1], [0, 0, 1, 1], [], []>} : vector<2x32xf32>, vector<32x128xf32>, vector<2x128xf32> -> vector<2x128xf32>
    %39 = arith.addf %37, %38 : vector<2x128xf32>
    %40 = vector.extract_strided_slice %39 {offsets = [0, 0], sizes = [2, 96], strides = [1, 1]} : vector<2x128xf32> to vector<2x96xf32>
    %41 = arith.negf %40 : vector<2x96xf32>
    %42 = math.exp %41 : vector<2x96xf32>
    %cst_14 = arith.constant 1.000000e+00 : f32
    %43 = vector.broadcast %cst_14 : f32 to vector<2x96xf32>
    %44 = arith.addf %43, %42 : vector<2x96xf32>
    %45 = arith.divf %43, %44 : vector<2x96xf32>
    %46 = vector.extract_strided_slice %45 {offsets = [0, 0], sizes = [2, 32], strides = [1, 1]} : vector<2x96xf32> to vector<2x32xf32>
    %47 = vector.extract_strided_slice %45 {offsets = [0, 32], sizes = [2, 32], strides = [1, 1]} : vector<2x96xf32> to vector<2x32xf32>
    %48 = vector.extract_strided_slice %45 {offsets = [0, 64], sizes = [2, 32], strides = [1, 1]} : vector<2x96xf32> to vector<2x32xf32>
    %49 = vector.extract_strided_slice %39 {offsets = [0, 96], sizes = [2, 32], strides = [1, 1]} : vector<2x128xf32> to vector<2x32xf32>
    %50 = math.tanh %49 : vector<2x32xf32>
    %51 = arith.mulf %47, %36 : vector<2x32xf32>
    %52 = arith.mulf %46, %50 : vector<2x32xf32>
    %53 = arith.addf %51, %52 : vector<2x32xf32>
    %54 = math.tanh %53 : vector<2x32xf32>
    %55 = arith.mulf %48, %54 : vector<2x32xf32>
    %c1_i32 = arith.constant 1 : i32
    %56 = vector.broadcast %c1_i32 : i32 to vector<2x1xi32>
    %57 = arith.cmpi sgt, %0, %56 : vector<2x1xi32>
    %58 = vector.shape_cast %57 : vector<2x1xi1> to vector<2x1xi1>
    %59 = vector.broadcast %58 : vector<2x1xi1> to vector<2x32xi1>
    %60 = arith.select %59, %55, %33 : vector<2x32xi1>, vector<2x32xf32>
    %61 = vector.shape_cast %57 : vector<2x1xi1> to vector<2x1xi1>
    %62 = vector.broadcast %61 : vector<2x1xi1> to vector<2x32xi1>
    %63 = arith.select %62, %53, %36 : vector<2x32xi1>, vector<2x32xf32>
    %64 = vector.extract_strided_slice %7 {offsets = [4, 0], sizes = [2, 128], strides = [1, 1]} : vector<16x128xf32> to vector<2x128xf32>
    %cst_15 = arith.constant dense<0.000000e+00> : vector<2x128xf32>
    %65 = tpu.matmul %60, %1, %cst_15 {dimension_numbers = #tpu.dot_dimension_numbers<[1], [0], [0], [1], [0, 0, 1, 1], [], []>} : vector<2x32xf32>, vector<32x128xf32>, vector<2x128xf32> -> vector<2x128xf32>
    %66 = arith.addf %64, %65 : vector<2x128xf32>
    %67 = vector.extract_strided_slice %66 {offsets = [0, 0], sizes = [2, 96], strides = [1, 1]} : vector<2x128xf32> to vector<2x96xf32>
    %68 = arith.negf %67 : vector<2x96xf32>
    %69 = math.exp %68 : vector<2x96xf32>
    %cst_16 = arith.constant 1.000000e+00 : f32
    %70 = vector.broadcast %cst_16 : f32 to vector<2x96xf32>
    %71 = arith.addf %70, %69 : vector<2x96xf32>
    %72 = arith.divf %70, %71 : vector<2x96xf32>
    %73 = vector.extract_strided_slice %72 {offsets = [0, 0], sizes = [2, 32], strides = [1, 1]} : vector<2x96xf32> to vector<2x32xf32>
    %74 = vector.extract_strided_slice %72 {offsets = [0, 32], sizes = [2, 32], strides = [1, 1]} : vector<2x96xf32> to vector<2x32xf32>
    %75 = vector.extract_strided_slice %72 {offsets = [0, 64], sizes = [2, 32], strides = [1, 1]} : vector<2x96xf32> to vector<2x32xf32>
    %76 = vector.extract_strided_slice %66 {offsets = [0, 96], sizes = [2, 32], strides = [1, 1]} : vector<2x128xf32> to vector<2x32xf32>
    %77 = math.tanh %76 : vector<2x32xf32>
    %78 = arith.mulf %74, %63 : vector<2x32xf32>
    %79 = arith.mulf %73, %77 : vector<2x32xf32>
    %80 = arith.addf %78, %79 : vector<2x32xf32>
    %81 = math.tanh %80 : vector<2x32xf32>
    %82 = arith.mulf %75, %81 : vector<2x32xf32>
    %c2_i32 = arith.constant 2 : i32
    %83 = vector.broadcast %c2_i32 : i32 to vector<2x1xi32>
    %84 = arith.cmpi sgt, %0, %83 : vector<2x1xi32>
    %85 = vector.shape_cast %84 : vector<2x1xi1> to vector<2x1xi1>
    %86 = vector.broadcast %85 : vector<2x1xi1> to vector<2x32xi1>
    %87 = arith.select %86, %82, %60 : vector<2x32xi1>, vector<2x32xf32>
    %88 = vector.shape_cast %84 : vector<2x1xi1> to vector<2x1xi1>
    %89 = vector.broadcast %88 : vector<2x1xi1> to vector<2x32xi1>
    %90 = arith.select %89, %80, %63 : vector<2x32xi1>, vector<2x32xf32>
    %91 = vector.extract_strided_slice %7 {offsets = [6, 0], sizes = [2, 128], strides = [1, 1]} : vector<16x128xf32> to vector<2x128xf32>
    %cst_17 = arith.constant dense<0.000000e+00> : vector<2x128xf32>
    %92 = tpu.matmul %87, %1, %cst_17 {dimension_numbers = #tpu.dot_dimension_numbers<[1], [0], [0], [1], [0, 0, 1, 1], [], []>} : vector<2x32xf32>, vector<32x128xf32>, vector<2x128xf32> -> vector<2x128xf32>
    %93 = arith.addf %91, %92 : vector<2x128xf32>
    %94 = vector.extract_strided_slice %93 {offsets = [0, 0], sizes = [2, 96], strides = [1, 1]} : vector<2x128xf32> to vector<2x96xf32>
    %95 = arith.negf %94 : vector<2x96xf32>
    %96 = math.exp %95 : vector<2x96xf32>
    %cst_18 = arith.constant 1.000000e+00 : f32
    %97 = vector.broadcast %cst_18 : f32 to vector<2x96xf32>
    %98 = arith.addf %97, %96 : vector<2x96xf32>
    %99 = arith.divf %97, %98 : vector<2x96xf32>
    %100 = vector.extract_strided_slice %99 {offsets = [0, 0], sizes = [2, 32], strides = [1, 1]} : vector<2x96xf32> to vector<2x32xf32>
    %101 = vector.extract_strided_slice %99 {offsets = [0, 32], sizes = [2, 32], strides = [1, 1]} : vector<2x96xf32> to vector<2x32xf32>
    %102 = vector.extract_strided_slice %99 {offsets = [0, 64], sizes = [2, 32], strides = [1, 1]} : vector<2x96xf32> to vector<2x32xf32>
    %103 = vector.extract_strided_slice %93 {offsets = [0, 96], sizes = [2, 32], strides = [1, 1]} : vector<2x128xf32> to vector<2x32xf32>
    %104 = math.tanh %103 : vector<2x32xf32>
    %105 = arith.mulf %101, %90 : vector<2x32xf32>
    %106 = arith.mulf %100, %104 : vector<2x32xf32>
    %107 = arith.addf %105, %106 : vector<2x32xf32>
    %108 = math.tanh %107 : vector<2x32xf32>
    %109 = arith.mulf %102, %108 : vector<2x32xf32>
    %c3_i32 = arith.constant 3 : i32
    %110 = vector.broadcast %c3_i32 : i32 to vector<2x1xi32>
    %111 = arith.cmpi sgt, %0, %110 : vector<2x1xi32>
    %112 = vector.shape_cast %111 : vector<2x1xi1> to vector<2x1xi1>
    %113 = vector.broadcast %112 : vector<2x1xi1> to vector<2x32xi1>
    %114 = arith.select %113, %109, %87 : vector<2x32xi1>, vector<2x32xf32>
    %115 = vector.shape_cast %111 : vector<2x1xi1> to vector<2x1xi1>
    %116 = vector.broadcast %115 : vector<2x1xi1> to vector<2x32xi1>
    %117 = arith.select %116, %107, %90 : vector<2x32xi1>, vector<2x32xf32>
    %118 = vector.extract_strided_slice %7 {offsets = [8, 0], sizes = [2, 128], strides = [1, 1]} : vector<16x128xf32> to vector<2x128xf32>
    %cst_19 = arith.constant dense<0.000000e+00> : vector<2x128xf32>
    %119 = tpu.matmul %114, %1, %cst_19 {dimension_numbers = #tpu.dot_dimension_numbers<[1], [0], [0], [1], [0, 0, 1, 1], [], []>} : vector<2x32xf32>, vector<32x128xf32>, vector<2x128xf32> -> vector<2x128xf32>
    %120 = arith.addf %118, %119 : vector<2x128xf32>
    %121 = vector.extract_strided_slice %120 {offsets = [0, 0], sizes = [2, 96], strides = [1, 1]} : vector<2x128xf32> to vector<2x96xf32>
    %122 = arith.negf %121 : vector<2x96xf32>
    %123 = math.exp %122 : vector<2x96xf32>
    %cst_20 = arith.constant 1.000000e+00 : f32
    %124 = vector.broadcast %cst_20 : f32 to vector<2x96xf32>
    %125 = arith.addf %124, %123 : vector<2x96xf32>
    %126 = arith.divf %124, %125 : vector<2x96xf32>
    %127 = vector.extract_strided_slice %126 {offsets = [0, 0], sizes = [2, 32], strides = [1, 1]} : vector<2x96xf32> to vector<2x32xf32>
    %128 = vector.extract_strided_slice %126 {offsets = [0, 32], sizes = [2, 32], strides = [1, 1]} : vector<2x96xf32> to vector<2x32xf32>
    %129 = vector.extract_strided_slice %126 {offsets = [0, 64], sizes = [2, 32], strides = [1, 1]} : vector<2x96xf32> to vector<2x32xf32>
    %130 = vector.extract_strided_slice %120 {offsets = [0, 96], sizes = [2, 32], strides = [1, 1]} : vector<2x128xf32> to vector<2x32xf32>
    %131 = math.tanh %130 : vector<2x32xf32>
    %132 = arith.mulf %128, %117 : vector<2x32xf32>
    %133 = arith.mulf %127, %131 : vector<2x32xf32>
    %134 = arith.addf %132, %133 : vector<2x32xf32>
    %135 = math.tanh %134 : vector<2x32xf32>
    %136 = arith.mulf %129, %135 : vector<2x32xf32>
    %c4_i32 = arith.constant 4 : i32
    %137 = vector.broadcast %c4_i32 : i32 to vector<2x1xi32>
    %138 = arith.cmpi sgt, %0, %137 : vector<2x1xi32>
    %139 = vector.shape_cast %138 : vector<2x1xi1> to vector<2x1xi1>
    %140 = vector.broadcast %139 : vector<2x1xi1> to vector<2x32xi1>
    %141 = arith.select %140, %136, %114 : vector<2x32xi1>, vector<2x32xf32>
    %142 = vector.shape_cast %138 : vector<2x1xi1> to vector<2x1xi1>
    %143 = vector.broadcast %142 : vector<2x1xi1> to vector<2x32xi1>
    %144 = arith.select %143, %134, %117 : vector<2x32xi1>, vector<2x32xf32>
    %145 = vector.extract_strided_slice %7 {offsets = [10, 0], sizes = [2, 128], strides = [1, 1]} : vector<16x128xf32> to vector<2x128xf32>
    %cst_21 = arith.constant dense<0.000000e+00> : vector<2x128xf32>
    %146 = tpu.matmul %141, %1, %cst_21 {dimension_numbers = #tpu.dot_dimension_numbers<[1], [0], [0], [1], [0, 0, 1, 1], [], []>} : vector<2x32xf32>, vector<32x128xf32>, vector<2x128xf32> -> vector<2x128xf32>
    %147 = arith.addf %145, %146 : vector<2x128xf32>
    %148 = vector.extract_strided_slice %147 {offsets = [0, 0], sizes = [2, 96], strides = [1, 1]} : vector<2x128xf32> to vector<2x96xf32>
    %149 = arith.negf %148 : vector<2x96xf32>
    %150 = math.exp %149 : vector<2x96xf32>
    %cst_22 = arith.constant 1.000000e+00 : f32
    %151 = vector.broadcast %cst_22 : f32 to vector<2x96xf32>
    %152 = arith.addf %151, %150 : vector<2x96xf32>
    %153 = arith.divf %151, %152 : vector<2x96xf32>
    %154 = vector.extract_strided_slice %153 {offsets = [0, 0], sizes = [2, 32], strides = [1, 1]} : vector<2x96xf32> to vector<2x32xf32>
    %155 = vector.extract_strided_slice %153 {offsets = [0, 32], sizes = [2, 32], strides = [1, 1]} : vector<2x96xf32> to vector<2x32xf32>
    %156 = vector.extract_strided_slice %153 {offsets = [0, 64], sizes = [2, 32], strides = [1, 1]} : vector<2x96xf32> to vector<2x32xf32>
    %157 = vector.extract_strided_slice %147 {offsets = [0, 96], sizes = [2, 32], strides = [1, 1]} : vector<2x128xf32> to vector<2x32xf32>
    %158 = math.tanh %157 : vector<2x32xf32>
    %159 = arith.mulf %155, %144 : vector<2x32xf32>
    %160 = arith.mulf %154, %158 : vector<2x32xf32>
    %161 = arith.addf %159, %160 : vector<2x32xf32>
    %162 = math.tanh %161 : vector<2x32xf32>
    %163 = arith.mulf %156, %162 : vector<2x32xf32>
    %c5_i32 = arith.constant 5 : i32
    %164 = vector.broadcast %c5_i32 : i32 to vector<2x1xi32>
    %165 = arith.cmpi sgt, %0, %164 : vector<2x1xi32>
    %166 = vector.shape_cast %165 : vector<2x1xi1> to vector<2x1xi1>
    %167 = vector.broadcast %166 : vector<2x1xi1> to vector<2x32xi1>
    %168 = arith.select %167, %163, %141 : vector<2x32xi1>, vector<2x32xf32>
    %169 = vector.shape_cast %165 : vector<2x1xi1> to vector<2x1xi1>
    %170 = vector.broadcast %169 : vector<2x1xi1> to vector<2x32xi1>
    %171 = arith.select %170, %161, %144 : vector<2x32xi1>, vector<2x32xf32>
    %172 = vector.extract_strided_slice %7 {offsets = [12, 0], sizes = [2, 128], strides = [1, 1]} : vector<16x128xf32> to vector<2x128xf32>
    %cst_23 = arith.constant dense<0.000000e+00> : vector<2x128xf32>
    %173 = tpu.matmul %168, %1, %cst_23 {dimension_numbers = #tpu.dot_dimension_numbers<[1], [0], [0], [1], [0, 0, 1, 1], [], []>} : vector<2x32xf32>, vector<32x128xf32>, vector<2x128xf32> -> vector<2x128xf32>
    %174 = arith.addf %172, %173 : vector<2x128xf32>
    %175 = vector.extract_strided_slice %174 {offsets = [0, 0], sizes = [2, 96], strides = [1, 1]} : vector<2x128xf32> to vector<2x96xf32>
    %176 = arith.negf %175 : vector<2x96xf32>
    %177 = math.exp %176 : vector<2x96xf32>
    %cst_24 = arith.constant 1.000000e+00 : f32
    %178 = vector.broadcast %cst_24 : f32 to vector<2x96xf32>
    %179 = arith.addf %178, %177 : vector<2x96xf32>
    %180 = arith.divf %178, %179 : vector<2x96xf32>
    %181 = vector.extract_strided_slice %180 {offsets = [0, 0], sizes = [2, 32], strides = [1, 1]} : vector<2x96xf32> to vector<2x32xf32>
    %182 = vector.extract_strided_slice %180 {offsets = [0, 32], sizes = [2, 32], strides = [1, 1]} : vector<2x96xf32> to vector<2x32xf32>
    %183 = vector.extract_strided_slice %180 {offsets = [0, 64], sizes = [2, 32], strides = [1, 1]} : vector<2x96xf32> to vector<2x32xf32>
    %184 = vector.extract_strided_slice %174 {offsets = [0, 96], sizes = [2, 32], strides = [1, 1]} : vector<2x128xf32> to vector<2x32xf32>
    %185 = math.tanh %184 : vector<2x32xf32>
    %186 = arith.mulf %182, %171 : vector<2x32xf32>
    %187 = arith.mulf %181, %185 : vector<2x32xf32>
    %188 = arith.addf %186, %187 : vector<2x32xf32>
    %189 = math.tanh %188 : vector<2x32xf32>
    %190 = arith.mulf %183, %189 : vector<2x32xf32>
    %c6_i32 = arith.constant 6 : i32
    %191 = vector.broadcast %c6_i32 : i32 to vector<2x1xi32>
    %192 = arith.cmpi sgt, %0, %191 : vector<2x1xi32>
    %193 = vector.shape_cast %192 : vector<2x1xi1> to vector<2x1xi1>
    %194 = vector.broadcast %193 : vector<2x1xi1> to vector<2x32xi1>
    %195 = arith.select %194, %190, %168 : vector<2x32xi1>, vector<2x32xf32>
    %196 = vector.shape_cast %192 : vector<2x1xi1> to vector<2x1xi1>
    %197 = vector.broadcast %196 : vector<2x1xi1> to vector<2x32xi1>
    %198 = arith.select %197, %188, %171 : vector<2x32xi1>, vector<2x32xf32>
    %199 = vector.extract_strided_slice %7 {offsets = [14, 0], sizes = [2, 128], strides = [1, 1]} : vector<16x128xf32> to vector<2x128xf32>
    %cst_25 = arith.constant dense<0.000000e+00> : vector<2x128xf32>
    %200 = tpu.matmul %195, %1, %cst_25 {dimension_numbers = #tpu.dot_dimension_numbers<[1], [0], [0], [1], [0, 0, 1, 1], [], []>} : vector<2x32xf32>, vector<32x128xf32>, vector<2x128xf32> -> vector<2x128xf32>
    %201 = arith.addf %199, %200 : vector<2x128xf32>
    %202 = vector.extract_strided_slice %201 {offsets = [0, 0], sizes = [2, 96], strides = [1, 1]} : vector<2x128xf32> to vector<2x96xf32>
    %203 = arith.negf %202 : vector<2x96xf32>
    %204 = math.exp %203 : vector<2x96xf32>
    %cst_26 = arith.constant 1.000000e+00 : f32
    %205 = vector.broadcast %cst_26 : f32 to vector<2x96xf32>
    %206 = arith.addf %205, %204 : vector<2x96xf32>
    %207 = arith.divf %205, %206 : vector<2x96xf32>
    %208 = vector.extract_strided_slice %207 {offsets = [0, 0], sizes = [2, 32], strides = [1, 1]} : vector<2x96xf32> to vector<2x32xf32>
    %209 = vector.extract_strided_slice %207 {offsets = [0, 32], sizes = [2, 32], strides = [1, 1]} : vector<2x96xf32> to vector<2x32xf32>
    %210 = vector.extract_strided_slice %207 {offsets = [0, 64], sizes = [2, 32], strides = [1, 1]} : vector<2x96xf32> to vector<2x32xf32>
    %211 = vector.extract_strided_slice %201 {offsets = [0, 96], sizes = [2, 32], strides = [1, 1]} : vector<2x128xf32> to vector<2x32xf32>
    %212 = math.tanh %211 : vector<2x32xf32>
    %213 = arith.mulf %209, %198 : vector<2x32xf32>
    %214 = arith.mulf %208, %212 : vector<2x32xf32>
    %215 = arith.addf %213, %214 : vector<2x32xf32>
    %216 = math.tanh %215 : vector<2x32xf32>
    %217 = arith.mulf %210, %216 : vector<2x32xf32>
    %c7_i32 = arith.constant 7 : i32
    %218 = vector.broadcast %c7_i32 : i32 to vector<2x1xi32>
    %219 = arith.cmpi sgt, %0, %218 : vector<2x1xi32>
    %220 = vector.shape_cast %219 : vector<2x1xi1> to vector<2x1xi1>
    %221 = vector.broadcast %220 : vector<2x1xi1> to vector<2x32xi1>
    %222 = arith.select %221, %217, %195 : vector<2x32xi1>, vector<2x32xf32>
    %c0_27 = arith.constant 0 : index
    %c0_28 = arith.constant 0 : index
    %223 = vector.load %arg5[%c0_27, %c0_28] : memref<32x16xf32, #tpu.memory_space<vmem>>, vector<32x16xf32>
    %cst_29 = arith.constant dense<0.000000e+00> : vector<2x16xf32>
    %224 = tpu.matmul %222, %223, %cst_29 {dimension_numbers = #tpu.dot_dimension_numbers<[1], [0], [0], [1], [0, 0, 1, 1], [], []>} : vector<2x32xf32>, vector<32x16xf32>, vector<2x16xf32> -> vector<2x16xf32>
    %c0_30 = arith.constant 0 : index
    %c0_31 = arith.constant 0 : index
    %225 = vector.load %arg6[%c0_30, %c0_31] : memref<1x16xf32, #tpu.memory_space<vmem>>, vector<1x16xf32>
    %226 = vector.broadcast %225 : vector<1x16xf32> to vector<2x16xf32>
    %227 = arith.addf %224, %226 : vector<2x16xf32>
    %c0_32 = arith.constant 0 : index
    %c0_33 = arith.constant 0 : index
    %228 = vector.load %arg7[%c0_32, %c0_33] : memref<2x16xf32, #tpu.memory_space<vmem>>, vector<2x16xf32>
    tpu.vector_store %arg7[%c0_32, %c0_33], %227 {strides = array<i32>} : memref<2x16xf32, #tpu.memory_space<vmem>>, vector<2x16xf32>,
    return
  }
}

</mosaic_0001>

<bundles_post_ra>
// kernel: auvi_subnet_forward.1
= control target key start
LH: loop header
LB: loop body
LE: loop exit
PB: predicated region body
PF: predicated region fallthrough
CT: control target
= control target key end

     0   :  { %vm43_vm0 = vcmask 130048   ;;  %v1522_v3 = vmov 0.0|0.0   ;;  %vm1523_vm1 = vmmov 0   ;;  %v1524_v10 = vmov 0.0   ;;  %s1775_s0 = inlined_call_operand.vmem [shape: f32[16,16], index: 0, kind: input, shape index: {}]   ;;  %s1776_s1 = inlined_call_operand.vmem [shape: s32[2,1], index: 1, kind: input, shape index: {}]   ;;  %s1777_s2 = inlined_call_operand.vmem [shape: f32[16,128], index: 2, kind: input, shape index: {}]   ;;  %s1778_s3 = inlined_call_operand.vmem [shape: f32[32,128], index: 3, kind: input, shape index: {}]   ;;  %s1779_s4 = inlined_call_operand.vmem [shape: f32[1,128], index: 4, kind: input, shape index: {}]   ;;  %s1780_s5 = inlined_call_operand.vmem [shape: f32[32,16], index: 5, kind: input, shape index: {}]   ;;  %s1781_s6 = inlined_call_operand.vmem [shape: f32[1,16], index: 6, kind: input, shape index: {}]   ;;  %s1782_s7 = inlined_call_operand.hbm [shape: f32[2,16], index: 7, kind: output, shape index: {}]  }
   0x1   :  { %v34_v0 = vld [vmem:[%s1777_s2] sm:$0xff]  ;;  %v35_v1 = vld [vmem:[%s1777_s2 + $0x8] sm:$0xff]  ;;  %1370 = vmatprep.subr.bf16.mxu1 %v1522_v3  ;;  %v30_v8 = vld [vmem:[%s1778_s3 + $0x10] sm:$0xff]  ;;  %1275 = vmatprep.mubr.msk.f32.mxu1 %vm1523_vm1, %v1524_v10 }
   0x2   :  { %v28_v2 = vld [vmem:[%s1778_s3] sm:$0xff]  ;;  %v1366_v4 = vpack.c.bf16 %v35_v1, %v34_v0  ;;  %v29_v5 = vld [vmem:[%s1778_s3 + $0x8] sm:$0xff]  ;;  %v31_v9 = vld [vmem:[%s1778_s3 + $0x18] sm:$0xff] }
   0x3   :  { %v32_v6 = vld [vmem:[%s1775_s0] sm:$0xff]  ;;  %v1586_v7 = vpack.c.bf16 %v29_v5, %v28_v2 }
   0x4   :  { %1264 = vmatprep.mubr.msk.f32.mxu0 %vm43_vm0, %v32_v6 }
   0x5   :  { %12 = vsyncpa [#allocation3], 0  ;;  %1367 = vmatprep.subr.bf16.mxu0 %v1366_v4  ;;  %1372 = vmatpush3.bf16.msra.mxu1 %v1586_v7  ;;  %v33_v11 = vld [vmem:[%s1775_s0 + $0x8] sm:$0xff]  ;;  %v1601_v12 = vpack.c.bf16 %v31_v9, %v30_v8  ;;  %v1624_v13 = vld [vmem:[%s1776_s1] sm:$0x3]  ;;  %v1525_v14 = vmov 0  }
   0x6   :  { %1369 = vmatpush3.bf16.msra.mxu0 %v1366_v4  ;;  %1373 = vmatprep.subr.bf16.mxu1 %v1522_v3  ;;  %vm224_vm2 = vcmp.gt.s32.totalorder %v1624_v13, 0  ;;  %v1191_v16 = vld [vmem:[%s1779_s4] ss:$0 sm:$0xff]  ;;  %s1526_s1 = smov 32   ;;  %s1527_s4 = smov 64   ;;  %vm125_vm4 = vcmask 261120  }
   0x7   :  { %1376 = vmatprep.subr.bf16.mxu0 %v1522_v3  ;;  %1432 = vset.pattern.permute.xlu1 %v1525_v14  ;;  %v225_v15 = vsel %vm224_vm2, 1, %v1525_v14  ;;  %vm338_vm5 = vcmp.gt.s32.totalorder %v1624_v13, 1  ;;  %s1528_s18 = smov 96   ;;  %vm466_vm7 = vcmp.gt.s32.totalorder %v1624_v13, 2  ;;  %vm590_vm9 = vcmp.gt.s32.totalorder %v1624_v13, 3  ;;  %s1529_s28 = smov [#allocation2]  }
   0x8   :  { %1433 = vset.pattern.permute.xlu0 %v1525_v14  ;;  %227 = vperm.xlu1 %1432, %v225_v15   ;;  %v339_v51 = vsel %vm338_vm5, 1, %v1525_v14  ;;  %vm710_vm11 = vcmp.gt.s32.totalorder %v1624_v13, 4  ;;  %vm827_vm13 = vcmp.gt.s32.totalorder %v1624_v13, 5  ;;  %vm955_vm15 = vcmp.gt.s32.totalorder %v1624_v13, 6  ;;  %s1183_s29 = sshll.u32 %s1529_s28, 4  ;;  %s1184_s29 = int_to_ptr.vmem [resolvable:$true] %s1183_s29 }
   0x9   :  { %1265 = vmatmul.mubr.msk.f32.vlgmr.msra.gmra.mrb[0].mxu0 %vm43_vm0, %v33_v11  ;;  %1375 = vmatpush3.bf16.msra.mxu1 %v1601_v12  ;;  %s1498_s30 = scalar_lea.vmem %s1184_s29, 32  ;;  %p1503_p1 = scmp.lt.s32.totalorder %s1184_s29, %s1184_s29 }
   0xa   :  { %1378 = vmatpush3.bf16.msra.mxu0 %v1586_v7  ;;  %1286 = vmatprep.mubr.msk.f32.mxu0 %vm1523_vm1, %v1524_v10  ;;  %p1499_p0 = scmp.ne.s32.totalorder %s1184_s29, %s1498_s30  ;;  %p1504_p2 = scmp.lt.s32.totalorder %s1498_s30, %s1498_s30 }
   0xb   :  { %1379 = vmatprep.subr.bf16.mxu0 %v1522_v3  ;;  %1382 = vmatprep.subr.bf16.mxu1 %v1522_v3 }
   0xc   :  { %1276 = vmatmul.mubr.f32.vlgmr.msra.gmra.mrb[0].mxu1 %v1524_v10  ;;  %p1505_p3 = por %p1504_p2, %p1503_p1 }
   0xd   :  { %1384 = vmatpush3.bf16.msra.mxu1 %v1586_v7  ;;  %1297 = vmatprep.mubr.msk.f32.mxu1 %vm1523_vm1, %v1524_v10 }
   0xe   :  { %1381 = vmatpush3.bf16.msra.mxu0 %v1601_v12  ;;  %1385 = vmatprep.subr.bf16.mxu1 %v1522_v3  ;;  %p1506_p4 = pnand %p1505_p3, %p1499_p0 }
   0xf   :  { %1388 = vmatprep.subr.bf16.mxu0 %v1522_v3 }
  0x11   :  { %1387 = vmatpush3.bf16.msra.mxu1 %v1601_v12 }
  0x12   :  { %1394 = vmatprep.subr.bf16.mxu1 %v1522_v3 }
  0x87   :  { %v228_v35 = vpop.permute.xlu1 %227 }
  0x88   :  { %vm229_vm3 = vcmp.eq.s32.totalorder %v228_v35, 1 }
  0xdc   :  { %v1266_v17 = vpop.f32.mrb[0].mxu0 }
  0xdd   :  { %v1633_v18 = vadd.f32 %v1266_v17, %v1191_v16  ;;  %v116_v19 = vpop.f32.mrb[1].mxu0 }
  0xde   :  { %v1635_v20 = vadd.f32 %v1191_v16, %v116_v19 }
  0xdf   :  { %v195_v21 = vpop.f32.mrb[0].mxu1 }
  0xe0   :  { %v199_v22 = vadd.f32 %v195_v21, %v1635_v20  ;;  %v1277_v23 = vpop.f32.mrb[1].mxu1 }
  0xe2   :  { %1434 = vtanh.f32 %v199_v22  ;;  %v1194_v25 = vmul.f32 -1.442695, %v199_v22 }
  0xe4   :  { %1436 = vpow2.f32 %v1194_v25 }
  0xec   :  { %v1435_v24 = vpop.eup %1434 }
  0xed   :  { %209 = vrot.lane.b32.xlu0 %v1435_v24, %s1526_s1  ;;  %v467_v24 = vsel %vm466_vm7, 1, %v1525_v14 }
  0xee   :  { %v1437_v26 = vpop.eup %1436 }
  0xef   :  { %v203_v27 = vadd.f32 1.0, %v1437_v26 }
  0xf1   :  { %1438 = vrcp.f32 %v203_v27 }
  0xfb   :  { %v1439_v28 = vpop.eup %1438 }
  0xfc   :  { %v207_v31 = vmul.f32 0.0, %v1439_v28 }
 0x15f   :  { %v210_v29 = vpop.permute.xlu0 %209 }
 0x160   :  { %v212_v30 = vmul.f32 %v1439_v28, %v210_v29 }
 0x162   :  { %214 = vrot.lane.b32.xlu0 %v212_v30, %s1526_s1 }
 0x1d4   :  { %v215_v32 = vpop.permute.xlu0 %214 }
 0x1d5   :  { %v217_v33 = vadd.f32 %v215_v32, %v207_v31 }
 0x1d7   :  { %1440 = vtanh.f32 %v217_v33  ;;  %v231_v52 = vsel %vm229_vm3, %v217_v33, 0.0 }
 0x1d8   :  { %v319_v53 = vrot.slane %v231_v52, 6 }
 0x1e1   :  { %v1441_v34 = vpop.eup %1440 }
 0x1e2   :  { %220 = vrot.lane.b32.xlu1 %v1441_v34, %s1526_s1 }
 0x254   :  { %v221_v36 = vpop.permute.xlu1 %220 }
 0x255   :  { %v223_v37 = vmul.f32 %v1439_v28, %v221_v36 }
 0x257   :  { %v230_v38 = vsel %vm229_vm3, %v223_v37, 0.0  ;;  %vm1175_vm3 = vcmask 123904  }
 0x258   :  { %233 = vrot.lane.b32.xlu0 %v230_v38, %s1527_s4 }
 0x2ca   :  { %v234_v39 = vpop.permute.xlu0 %233 }
 0x2cb   :  { %1287 = vmatmul.mubr.msk.f32.vlgmr.msra.gmra.mrb[2].mxu0 %vm125_vm4, %v234_v39 }
 0x2cc   :  { %1390 = vmatpush3.bf16.msra.mxu0 %v1586_v7  ;;  %1308 = vmatprep.mubr.msk.f32.mxu0 %vm1523_vm1, %v1524_v10 }
 0x2cd   :  { %1391 = vmatprep.subr.bf16.mxu0 %v1522_v3 }
 0x2d0   :  { %1393 = vmatpush3.bf16.msra.mxu0 %v1601_v12 }
 0x2d1   :  { %1400 = vmatprep.subr.bf16.mxu0 %v1522_v3 }
 0x39e   :  { %v303_v40 = vpop.f32.mrb[2].mxu0 }
 0x39f   :  { %v308_v41 = vrot.slane %v303_v40, 6  ;;  %v1288_v42 = vpop.f32.mrb[3].mxu0 }
 0x3a1   :  { %v310_v43 = vadd.f32 %v308_v41, %v1635_v20 }
 0x3a3   :  { %1442 = vtanh.f32 %v310_v43  ;;  %v1196_v45 = vmul.f32 -1.442695, %v310_v43 }
 0x3a5   :  { %1444 = vpow2.f32 %v1196_v45 }
 0x3ad   :  { %v1443_v44 = vpop.eup %1442 }
 0x3ae   :  { %323 = vrot.lane.b32.xlu1 %v1443_v44, %s1526_s1 }
 0x3af   :  { %v1445_v46 = vpop.eup %1444 }
 0x3b0   :  { %v314_v47 = vadd.f32 1.0, %v1445_v46 }
 0x3b2   :  { %1446 = vrcp.f32 %v314_v47 }
 0x3bc   :  { %v1447_v48 = vpop.eup %1446 }
 0x3bd   :  { %v321_v54 = vmul.f32 %v1447_v48, %v319_v53 }
 0x420   :  { %v324_v49 = vpop.permute.xlu1 %323 }
 0x421   :  { %v326_v50 = vmul.f32 %v1447_v48, %v324_v49 }
 0x423   :  { %328 = vrot.lane.b32.xlu0 %v326_v50, %s1526_s1 }
 0x427   :  { %341 = vperm.xlu0 %1433, %v339_v51   ;;  %v591_v51 = vsel %vm590_vm9, 1, %v1525_v14 }
 0x42b   :  { %356 = vrot.lane.b32.xlu0 %v231_v52, %s1528_s18 }
 0x495   :  { %v329_v55 = vpop.permute.xlu0 %328 }
 0x496   :  { %v331_v56 = vadd.f32 %v329_v55, %v321_v54 }
 0x498   :  { %1448 = vtanh.f32 %v331_v56  ;;  %v352_v61 = vrot.slane %v331_v56, 2 }
 0x4a2   :  { %v1449_v57 = vpop.eup %1448 }
 0x4a3   :  { %334 = vrot.lane.b32.xlu1 %v1449_v57, %s1526_s1 }
 0x4a6   :  { %v342_v62 = vpop.permute.xlu0 %341 }
 0x4a7   :  { %vm343_vm6 = vcmp.eq.s32.totalorder %v342_v62, 1 }
 0x4aa   :  { %v357_v1 = vpop.permute.xlu0 %356 }
 0x515   :  { %v335_v58 = vpop.permute.xlu1 %334 }
 0x516   :  { %v337_v59 = vmul.f32 %v1447_v48, %v335_v58 }
 0x518   :  { %v345_v60 = vrot.slane %v337_v59, 2 }
 0x51a   :  { %346 = vrot.lane.b32.xlu1 %v345_v60, %s1527_s4  ;;  %v711_v60 = vsel %vm710_vm11, 1, %v1525_v14 }
 0x51e   :  { %353 = vrot.lane.b32.xlu1 %v352_v61, %s1528_s18 }
 0x58c   :  { %v347_v63 = vpop.permute.xlu1 %346 }
 0x58d   :  { %v350_v0 = vsel %vm343_vm6, %v347_v63, %v234_v39 }
 0x58e   :  { %1298 = vmatmul.mubr.msk.f32.vlgmr.msra.gmra.mrb[2].mxu1 %vm125_vm4, %v350_v0 }
 0x58f   :  { %1396 = vmatpush3.bf16.msra.mxu1 %v1586_v7  ;;  %1319 = vmatprep.mubr.msk.f32.mxu1 %vm1523_vm1, %v1524_v10 }
 0x590   :  { %v354_v2 = vpop.permute.xlu1 %353  ;;  %1397 = vmatprep.subr.bf16.mxu1 %v1522_v3 }
 0x591   :  { %v359_v4 = vsel %vm343_vm6, %v354_v2, %v357_v1 }
 0x592   :  { %v445_v5 = vrot.slane %v359_v4, 4 }
 0x593   :  { %1399 = vmatpush3.bf16.msra.mxu1 %v1601_v12 }
 0x594   :  { %446 = vrot.lane.b32.xlu0 %v445_v5, %s1526_s1  ;;  %1406 = vmatprep.subr.bf16.mxu1 %v1522_v3 }
 0x606   :  { %v447_v25 = vpop.permute.xlu0 %446 }
 0x661   :  { %v429_v6 = vpop.f32.mrb[2].mxu1 }
 0x662   :  { %v434_v8 = vrot.slane %v429_v6, 4  ;;  %v1299_v9 = vpop.f32.mrb[3].mxu1 }
 0x664   :  { %v436_v11 = vadd.f32 %v434_v8, %v1635_v20 }
 0x666   :  { %1450 = vtanh.f32 %v436_v11  ;;  %v1198_v16 = vmul.f32 -1.442695, %v436_v11 }
 0x668   :  { %1452 = vpow2.f32 %v1198_v16 }
 0x670   :  { %v1451_v15 = vpop.eup %1450 }
 0x671   :  { %451 = vrot.lane.b32.xlu1 %v1451_v15, %s1526_s1 }
 0x672   :  { %v1453_v17 = vpop.eup %1452 }
 0x673   :  { %v440_v19 = vadd.f32 1.0, %v1453_v17 }
 0x675   :  { %1454 = vrcp.f32 %v440_v19 }
 0x67f   :  { %v1455_v21 = vpop.eup %1454 }
 0x680   :  { %v449_v26 = vmul.f32 %v1455_v21, %v447_v25 }
 0x6e3   :  { %v452_v22 = vpop.permute.xlu1 %451 }
 0x6e4   :  { %v454_v23 = vmul.f32 %v1455_v21, %v452_v22 }
 0x6e6   :  { %456 = vrot.lane.b32.xlu1 %v454_v23, %s1526_s1 }
 0x6ea   :  { %469 = vperm.xlu1 %1432, %v467_v24  }
 0x758   :  { %v457_v27 = vpop.permute.xlu1 %456 }
 0x759   :  { %v459_v28 = vadd.f32 %v457_v27, %v449_v26 }
 0x75b   :  { %1456 = vtanh.f32 %v459_v28  ;;  %v479_v29 = vrot.slane %v459_v28, 4 }
 0x75d   :  { %480 = vrot.lane.b32.xlu1 %v479_v29, %s1528_s18 }
 0x765   :  { %v1457_v30 = vpop.eup %1456 }
 0x766   :  { %462 = vrot.lane.b32.xlu0 %v1457_v30, %s1526_s1 }
 0x769   :  { %v470_v31 = vpop.permute.xlu1 %469 }
 0x76a   :  { %vm471_vm8 = vcmp.eq.s32.totalorder %v470_v31, 1 }
 0x7cf   :  { %v481_v32 = vpop.permute.xlu1 %480 }
 0x7d0   :  { %v483_v33 = vsel %vm471_vm8, %v481_v32, %v359_v4 }
 0x7d1   :  { %v569_v34 = vrot.slane %v483_v33, 2 }
 0x7d3   :  { %570 = vrot.lane.b32.xlu1 %v569_v34, %s1526_s1 }
 0x7d8   :  { %v463_v35 = vpop.permute.xlu0 %462 }
 0x7d9   :  { %v465_v36 = vmul.f32 %v1455_v21, %v463_v35 }
 0x7db   :  { %v473_v37 = vrot.slane %v465_v36, 4 }
 0x7dd   :  { %474 = vrot.lane.b32.xlu0 %v473_v37, %s1527_s4 }
 0x84f   :  { %v475_v38 = vpop.permute.xlu0 %474 }
 0x850   :  { %v477_v39 = vsel %vm471_vm8, %v475_v38, %v350_v0 }
 0x851   :  { %1309 = vmatmul.mubr.msk.f32.vlgmr.msra.gmra.mrb[4].mxu0 %vm125_vm4, %v477_v39 }
 0x852   :  { %1402 = vmatpush3.bf16.msra.mxu0 %v1586_v7  ;;  %1330 = vmatprep.mubr.msk.f32.mxu0 %vm1523_vm1, %v1524_v10 }
 0x853   :  { %1403 = vmatprep.subr.bf16.mxu0 %v1522_v3 }
 0x856   :  { %1405 = vmatpush3.bf16.msra.mxu0 %v1601_v12 }
 0x857   :  { %1412 = vmatprep.subr.bf16.mxu0 %v1522_v3 }
 0x924   :  { %v553_v40 = vpop.f32.mrb[4].mxu0 }
 0x925   :  { %v558_v41 = vrot.slane %v553_v40, 2  ;;  %v1310_v42 = vpop.f32.mrb[5].mxu0 }
 0x927   :  { %v560_v43 = vadd.f32 %v558_v41, %v1635_v20  ;;  %v571_v20 = vpop.permute.xlu1 %570 }
 0x929   :  { %1458 = vtanh.f32 %v560_v43  ;;  %v1200_v45 = vmul.f32 -1.442695, %v560_v43 }
 0x92b   :  { %1460 = vpow2.f32 %v1200_v45 }
 0x933   :  { %v1459_v44 = vpop.eup %1458 }
 0x934   :  { %575 = vrot.lane.b32.xlu0 %v1459_v44, %s1526_s1 }
 0x935   :  { %v1461_v46 = vpop.eup %1460 }
 0x936   :  { %v564_v47 = vadd.f32 1.0, %v1461_v46 }
 0x938   :  { %1462 = vrcp.f32 %v564_v47 }
 0x942   :  { %v1463_v48 = vpop.eup %1462 }
 0x943   :  { %v573_v52 = vmul.f32 %v1463_v48, %v571_v20 }
 0x9a6   :  { %v576_v49 = vpop.permute.xlu0 %575 }
 0x9a7   :  { %v578_v50 = vmul.f32 %v1463_v48, %v576_v49 }
 0x9a9   :  { %580 = vrot.lane.b32.xlu0 %v578_v50, %s1526_s1 }
 0x9ad   :  { %593 = vperm.xlu0 %1433, %v591_v51  }
 0xa1b   :  { %v581_v53 = vpop.permute.xlu0 %580 }
 0xa1c   :  { %v583_v54 = vadd.f32 %v581_v53, %v573_v52 }
 0xa1e   :  { %1464 = vtanh.f32 %v583_v54  ;;  %v603_v55 = vrot.slane %v583_v54, 6 }
 0xa20   :  { %604 = vrot.lane.b32.xlu0 %v603_v55, %s1528_s18 }
 0xa28   :  { %v1465_v56 = vpop.eup %1464 }
 0xa29   :  { %586 = vrot.lane.b32.xlu1 %v1465_v56, %s1526_s1 }
 0xa2c   :  { %v594_v57 = vpop.permute.xlu0 %593 }
 0xa2d   :  { %vm595_vm10 = vcmp.eq.s32.totalorder %v594_v57, 1 }
 0xa92   :  { %v605_v58 = vpop.permute.xlu0 %604 }
 0xa93   :  { %v607_v59 = vsel %vm595_vm10, %v605_v58, %v483_v33 }
 0xa94   :  { %690 = vrot.lane.b32.xlu0 %v607_v59, %s1526_s1 }
 0xa98   :  { %713 = vperm.xlu0 %1433, %v711_v60  }
 0xa9b   :  { %v587_v61 = vpop.permute.xlu1 %586 }
 0xa9c   :  { %v589_v62 = vmul.f32 %v1463_v48, %v587_v61 }
 0xa9e   :  { %v597_v63 = vrot.slane %v589_v62, 6 }
 0xaa0   :  { %598 = vrot.lane.b32.xlu1 %v597_v63, %s1527_s4 }
 0xb06   :  { %v691_v19 = vpop.permute.xlu0 %690 }
 0xb12   :  { %v599_v0 = vpop.permute.xlu1 %598 }
 0xb13   :  { %v601_v1 = vsel %vm595_vm10, %v599_v0, %v477_v39 }
 0xb14   :  { %716 = vrot.lane.b32.xlu0 %v601_v1, %s1527_s4  ;;  %1320 = vmatmul.mubr.msk.f32.vlgmr.msra.gmra.mrb[4].mxu1 %vm125_vm4, %v601_v1 }
 0xb15   :  { %1408 = vmatpush3.bf16.msra.mxu1 %v1586_v7  ;;  %1341 = vmatprep.mubr.msk.f32.mxu1 %vm1523_vm1, %v1524_v10 }
 0xb16   :  { %1409 = vmatprep.subr.bf16.mxu1 %v1522_v3 }
 0xb17   :  { %v714_v25 = vpop.permute.xlu0 %713 }
 0xb18   :  { %vm715_vm12 = vcmp.eq.s32.totalorder %v714_v25, 1 }
 0xb19   :  { %1411 = vmatpush3.bf16.msra.mxu1 %v1601_v12 }
 0xb1a   :  { %1418 = vmatprep.subr.bf16.mxu1 %v1522_v3 }
 0xb86   :  { %v717_v28 = vpop.permute.xlu0 %716 }
 0xbe7   :  { %v677_v2 = vpop.f32.mrb[4].mxu1 }
 0xbe8   :  { %v681_v4 = vadd.f32 %v677_v2, %v1633_v18  ;;  %v1321_v5 = vpop.f32.mrb[5].mxu1 }
 0xbea   :  { %1466 = vtanh.f32 %v681_v4  ;;  %v1202_v8 = vmul.f32 -1.442695, %v681_v4  ;;  %v956_v4 = vsel %vm955_vm15, 1, %v1525_v14 }
 0xbec   :  { %1468 = vpow2.f32 %v1202_v8 }
 0xbf4   :  { %v1467_v6 = vpop.eup %1466 }
 0xbf5   :  { %695 = vrot.lane.b32.xlu1 %v1467_v6, %s1526_s1 }
 0xbf6   :  { %v1469_v9 = vpop.eup %1468 }
 0xbf7   :  { %v685_v11 = vadd.f32 1.0, %v1469_v9 }
 0xbf9   :  { %1470 = vrcp.f32 %v685_v11 }
 0xc03   :  { %v1471_v15 = vpop.eup %1470 }
 0xc04   :  { %v693_v21 = vmul.f32 %v1471_v15, %v691_v19 }
 0xc67   :  { %v696_v16 = vpop.permute.xlu1 %695 }
 0xc68   :  { %v698_v17 = vmul.f32 %v1471_v15, %v696_v16 }
 0xc6a   :  { %700 = vrot.lane.b32.xlu1 %v698_v17, %s1526_s1 }
 0xcdc   :  { %v701_v22 = vpop.permute.xlu1 %700 }
 0xcdd   :  { %v703_v23 = vadd.f32 %v701_v22, %v693_v21 }
 0xcdf   :  { %1472 = vtanh.f32 %v703_v23  ;;  %v720_v41 = vsel %vm715_vm12, %v703_v23, %v691_v19 }
 0xce0   :  { %v808_v42 = vrot.slane %v720_v41, 6 }
 0xce9   :  { %v1473_v24 = vpop.eup %1472 }
 0xcea   :  { %706 = vrot.lane.b32.xlu1 %v1473_v24, %s1526_s1 }
 0xd5c   :  { %v707_v26 = vpop.permute.xlu1 %706 }
 0xd5d   :  { %v709_v27 = vmul.f32 %v1471_v15, %v707_v26 }
 0xd5f   :  { %v719_v29 = vsel %vm715_vm12, %v709_v27, %v717_v28 }
 0xd60   :  { %722 = vrot.lane.b32.xlu1 %v719_v29, %s1527_s4 }
 0xdd2   :  { %v723_v30 = vpop.permute.xlu1 %722 }
 0xdd3   :  { %1331 = vmatmul.mubr.msk.f32.vlgmr.msra.gmra.mrb[6].mxu0 %vm125_vm4, %v723_v30 }
 0xdd4   :  { %1414 = vmatpush3.bf16.msra.mxu0 %v1586_v7  ;;  %1352 = vmatprep.mubr.msk.f32.mxu0 %vm1523_vm1, %v1524_v10 }
 0xdd5   :  { %1415 = vmatprep.subr.bf16.mxu0 %v1522_v3 }
 0xdd8   :  { %1417 = vmatpush3.bf16.msra.mxu0 %v1601_v12  ;;  %v828_v12 = vsel %vm827_vm13, 1, %v1525_v14 }
 0xea6   :  { %v792_v31 = vpop.f32.mrb[6].mxu0 }
 0xea7   :  { %v797_v32 = vrot.slane %v792_v31, 6  ;;  %v1332_v33 = vpop.f32.mrb[7].mxu0 }
 0xea9   :  { %v799_v34 = vadd.f32 %v797_v32, %v1633_v18 }
 0xeab   :  { %1474 = vtanh.f32 %v799_v34  ;;  %v1204_v36 = vmul.f32 -1.442695, %v799_v34 }
 0xead   :  { %1476 = vpow2.f32 %v1204_v36 }
 0xeb5   :  { %v1475_v35 = vpop.eup %1474 }
 0xeb6   :  { %812 = vrot.lane.b32.xlu0 %v1475_v35, %s1526_s1 }
 0xeb7   :  { %v1477_v37 = vpop.eup %1476 }
 0xeb8   :  { %v803_v7 = vadd.f32 1.0, %v1477_v37 }
 0xeba   :  { %1478 = vrcp.f32 %v803_v7 }
 0xec4   :  { %v1479_v38 = vpop.eup %1478 }
 0xec5   :  { %v810_v43 = vmul.f32 %v1479_v38, %v808_v42 }
 0xf28   :  { %v813_v39 = vpop.permute.xlu0 %812 }
 0xf29   :  { %v815_v40 = vmul.f32 %v1479_v38, %v813_v39 }
 0xf2b   :  { %817 = vrot.lane.b32.xlu1 %v815_v40, %s1526_s1 }
 0xf2f   :  { %830 = vperm.xlu1 %1432, %v828_v12   ;;  %v1091_v12 = vld [vmem:[%s1780_s5] sm:$0xff] }
 0xf9d   :  { %v818_v44 = vpop.permute.xlu1 %817 }
 0xf9e   :  { %v820_v45 = vadd.f32 %v818_v44, %v810_v43 }
 0xfa0   :  { %1480 = vtanh.f32 %v820_v45  ;;  %v841_v46 = vrot.slane %v820_v45, 2 }
 0xfa2   :  { %842 = vrot.lane.b32.xlu1 %v841_v46, %s1528_s18 }
 0xfaa   :  { %v1481_v47 = vpop.eup %1480 }
 0xfab   :  { %823 = vrot.lane.b32.xlu0 %v1481_v47, %s1526_s1 }
 0xfae   :  { %v831_v51 = vpop.permute.xlu1 %830 }
 0xfaf   :  { %vm832_vm14 = vcmp.eq.s32.totalorder %v831_v51, 1  ;;  %v1209_v51 = vld [vmem:[%s1781_s6] ss:$0 sm:$0xff] }
0x1014   :  { %v843_v53 = vpop.permute.xlu1 %842 }
0x101d   :  { %v824_v48 = vpop.permute.xlu0 %823 }
0x101e   :  { %v826_v49 = vmul.f32 %v1479_v38, %v824_v48 }
0x1020   :  { %v834_v50 = vrot.slane %v826_v49, 2 }
0x1022   :  { %835 = vrot.lane.b32.xlu0 %v834_v50, %s1527_s4 }
0x1026   :  { %845 = vrot.lane.b32.xlu0 %v720_v41, %s1528_s18  ;;  %v1092_v41 = vld [vmem:[%s1780_s5 + $0x8] sm:$0xff] }
0x1027   :  { %v1419_v42 = vpack.c.bf16 %v1092_v41, %v1091_v12 }
0x1094   :  { %v836_v20 = vpop.permute.xlu0 %835 }
0x1095   :  { %v839_v52 = vsel %vm832_vm14, %v836_v20, %v723_v30 }
0x1096   :  { %1342 = vmatmul.mubr.msk.f32.vlgmr.msra.gmra.mrb[6].mxu1 %vm125_vm4, %v839_v52 }
0x1097   :  { %1363 = vmatprep.mubr.msk.f32.mxu1 %vm1523_vm1, %v1524_v10  ;;  %vm1079_vm1 = vcmp.gt.s32.totalorder %v1624_v13, 7  ;;  %v1093_v13 = vld [vmem:[%s1780_s5 + $0x10] sm:$0xff]  ;;  %1420 = vmatpush3.bf16.msra.mxu1 %v1419_v42 }
0x1098   :  { %v846_v54 = vpop.permute.xlu0 %845  ;;  %v1080_v7 = vsel %vm1079_vm1, 1, %v1525_v14  ;;  %v1094_v14 = vld [vmem:[%s1780_s5 + $0x18] sm:$0xff]  ;;  %1421 = vmatprep.subr.bf16.mxu1 %v1522_v3 }
0x1099   :  { %v848_v55 = vsel %vm832_vm14, %v843_v53, %v846_v54  ;;  %v1422_v43 = vpack.c.bf16 %v1094_v14, %v1093_v13 }
0x109a   :  { %v934_v56 = vrot.slane %v848_v55, 4 }
0x109b   :  { %1423 = vmatpush3.bf16.msra.mxu1 %v1422_v43 }
0x109c   :  { %935 = vrot.lane.b32.xlu0 %v934_v56, %s1526_s1 }
0x110e   :  { %v936_v5 = vpop.permute.xlu0 %935 }
0x1169   :  { %v918_v57 = vpop.f32.mrb[6].mxu1 }
0x116a   :  { %v923_v58 = vrot.slane %v918_v57, 4  ;;  %v1343_v59 = vpop.f32.mrb[7].mxu1 }
0x116c   :  { %v925_v60 = vadd.f32 %v923_v58, %v1633_v18 }
0x116e   :  { %1482 = vtanh.f32 %v925_v60  ;;  %v1206_v62 = vmul.f32 -1.442695, %v925_v60 }
0x1170   :  { %1484 = vpow2.f32 %v1206_v62 }
0x1178   :  { %v1483_v61 = vpop.eup %1482 }
0x1179   :  { %940 = vrot.lane.b32.xlu1 %v1483_v61, %s1526_s1 }
0x117a   :  { %v1485_v63 = vpop.eup %1484 }
0x117b   :  { %v929_v0 = vadd.f32 1.0, %v1485_v63 }
0x117d   :  { %1486 = vrcp.f32 %v929_v0 }
0x1187   :  { %v1487_v10 = vpop.eup %1486 }
0x1188   :  { %v938_v6 = vmul.f32 %v1487_v10, %v936_v5 }
0x11eb   :  { %v941_v1 = vpop.permute.xlu1 %940 }
0x11ec   :  { %v943_v2 = vmul.f32 %v1487_v10, %v941_v1 }
0x11ee   :  { %945 = vrot.lane.b32.xlu1 %v943_v2, %s1526_s1 }
0x11f2   :  { %958 = vperm.xlu1 %1432, %v956_v4  }
0x1260   :  { %v946_v8 = vpop.permute.xlu1 %945 }
0x1261   :  { %v948_v9 = vadd.f32 %v946_v8, %v938_v6 }
0x1263   :  { %1488 = vtanh.f32 %v948_v9  ;;  %v968_v11 = vrot.slane %v948_v9, 4 }
0x1265   :  { %969 = vrot.lane.b32.xlu1 %v968_v11, %s1528_s18 }
0x126d   :  { %v1489_v15 = vpop.eup %1488 }
0x126e   :  { %951 = vrot.lane.b32.xlu0 %v1489_v15, %s1526_s1 }
0x1271   :  { %v959_v16 = vpop.permute.xlu1 %958 }
0x1272   :  { %vm960_vm0 = vcmp.eq.s32.totalorder %v959_v16, 1 }
0x12d7   :  { %v970_v17 = vpop.permute.xlu1 %969 }
0x12d8   :  { %v972_v19 = vsel %vm960_vm0, %v970_v17, %v848_v55 }
0x12d9   :  { %v1058_v21 = vrot.slane %v972_v19, 2 }
0x12db   :  { %1059 = vrot.lane.b32.xlu1 %v1058_v21, %s1526_s1 }
0x12e0   :  { %v952_v22 = vpop.permute.xlu0 %951 }
0x12e1   :  { %v954_v23 = vmul.f32 %v1487_v10, %v952_v22 }
0x12e3   :  { %v962_v24 = vrot.slane %v954_v23, 4 }
0x12e5   :  { %963 = vrot.lane.b32.xlu0 %v962_v24, %s1527_s4 }
0x1357   :  { %v964_v25 = vpop.permute.xlu0 %963 }
0x1358   :  { %v966_v26 = vsel %vm960_vm0, %v964_v25, %v839_v52 }
0x1359   :  { %1353 = vmatmul.mubr.msk.f32.vlgmr.msra.gmra.mrb[8].mxu0 %vm125_vm4, %v966_v26 }
0x142c   :  { %v1042_v27 = vpop.f32.mrb[8].mxu0 }
0x142d   :  { %v1047_v28 = vrot.slane %v1042_v27, 2  ;;  %v1354_v29 = vpop.f32.mrb[9].mxu0 }
0x142f   :  { %v1049_v30 = vadd.f32 %v1047_v28, %v1633_v18  ;;  %v1060_v18 = vpop.permute.xlu1 %1059 }
0x1431   :  { %1490 = vtanh.f32 %v1049_v30  ;;  %v1208_v32 = vmul.f32 -1.442695, %v1049_v30 }
0x1433   :  { %1492 = vpow2.f32 %v1208_v32 }
0x143b   :  { %v1491_v31 = vpop.eup %1490 }
0x143c   :  { %1064 = vrot.lane.b32.xlu0 %v1491_v31, %s1526_s1 }
0x143d   :  { %v1493_v33 = vpop.eup %1492 }
0x143e   :  { %v1053_v34 = vadd.f32 1.0, %v1493_v33 }
0x1440   :  { %1494 = vrcp.f32 %v1053_v34 }
0x144a   :  { %v1495_v35 = vpop.eup %1494 }
0x144b   :  { %v1062_v38 = vmul.f32 %v1495_v35, %v1060_v18 }
0x14ae   :  { %v1065_v36 = vpop.permute.xlu0 %1064 }
0x14af   :  { %v1067_v37 = vmul.f32 %v1495_v35, %v1065_v36 }
0x14b1   :  { %1069 = vrot.lane.b32.xlu0 %v1067_v37, %s1526_s1 }
0x14b5   :  { %1082 = vperm.xlu0 %1433, %v1080_v7  }
0x1523   :  { %v1070_v39 = vpop.permute.xlu0 %1069 }
0x1524   :  { %v1072_v40 = vadd.f32 %v1070_v39, %v1062_v38 }
0x1526   :  { %1496 = vtanh.f32 %v1072_v40 }
0x1530   :  { %v1497_v44 = vpop.eup %1496 }
0x1531   :  { %1075 = vrot.lane.b32.xlu1 %v1497_v44, %s1526_s1 }
0x1534   :  { %v1083_v48 = vpop.permute.xlu0 %1082 }
0x1535   :  { %vm1084_vm2 = vcmp.eq.s32.totalorder %v1083_v48, 1 }
0x15a3   :  { %v1076_v45 = vpop.permute.xlu1 %1075 }
0x15a4   :  { %v1078_v46 = vmul.f32 %v1495_v35, %v1076_v45 }
0x15a6   :  { %v1086_v47 = vrot.slane %v1078_v46, 6 }
0x15a8   :  { %1087 = vrot.lane.b32.xlu1 %v1086_v47, %s1527_s4 }
0x161a   :  { %v1088_v49 = vpop.permute.xlu1 %1087 }
0x161b   :  { %v1090_v50 = vsel %vm1084_vm2, %v1088_v49, %v966_v26 }
0x161c   :  { %1364 = vmatmul.mubr.msk.f32.vlgmr.msra.gmra.mrb[8].mxu1 %vm125_vm4, %v1090_v50 }
0x16ef   :  { %v1171_v3 = vpop.f32.mrb[8].mxu1 }
0x16f0   :  { %v1172_v20 = vadd.f32 %v1209_v51, %v1171_v3  ;;  %v1365_v52 = vpop.f32.mrb[9].mxu1 }
0x16f2   :  { %1176 = vst.msk [vmem:[#allocation2] sm:$0x3] %vm1175_vm3, %v1172_v20 }
0x16f3   :  { %1509 = shalt.err (!%p1506_p4)
}
0x16f4   :  { %s1510_s10 = scalar_lea.hbm %s1782_s7, 32 }
0x16f5   :  { %p1511_p5 = scmp.ne.s32.totalorder %s1782_s7, %s1510_s10  ;;  %p1514_p6 = scmp.lt.u32.totalorder %s1510_s10, %s1782_s7 }
0x16f7   :  { %p1516_p7 = pnand %p1514_p6, %p1511_p5 }
0x16f9   :  { %1519 = shalt.err (!%p1516_p7)
}
0x16fa   :  { %1186 = dma.vmem_to_hbm [thread:$0]  %s1184_s29, 32, %s1782_s7, [#allocation3]  }
0x16fb   :  { %1520 = dma.done.wait [#allocation3], 32  }
0x16fc   :  { %1521 = vsyncadd [#allocation3], 4294967264 }
0x16fd   :  { %1190 = vsyncpa [#allocation3], 1 }

</bundles_post_ra>
